<compile_context>
chip_gen: v7x
topology: tpu7x:2x2x1
jax: 0.10.0
libtpu: 0.0.40
codegen_flags: <defaults>
</compile_context>

<pallas_src>
import functools

import jax
import jax.numpy as jnp
from jax.experimental import pallas as pl
from jax.experimental.pallas import tpu as pltpu


_LANE = 128
_SUBLANE = 8
_K_ALIGN = 32  # bf16 sublane packing alignment for w1's leading (contraction) dim


def _round_up(x, m):
    return (x + m - 1) // m * m


def _actor_kernel(s_ref, w1_ref, b1_ref, w2_ref, b2_ref, w3_ref, b3_ref,
                  o_ref, *, max_action):
    # Layer 1: Linear(state_dim -> 256) + ReLU.  bf16 MXU operands, f32 accumulate;
    # bias add / ReLU stay in f32 on the VPU (v5e has no bf16 VPU path).
    x = s_ref[...].astype(jnp.bfloat16)
    a = jnp.dot(x, w1_ref[...], preferred_element_type=jnp.float32)
    a = jnp.maximum(a + b1_ref[...], 0.0)
    # Layer 2: Linear(256 -> 256) + ReLU.
    a = jnp.dot(a.astype(jnp.bfloat16), w2_ref[...],
                preferred_element_type=jnp.float32)
    a = jnp.maximum(a + b2_ref[...], 0.0)
    # Layer 3: Linear(256 -> action_dim_padded), then max_action * tanh (EUP, f32).
    a = jnp.dot(a.astype(jnp.bfloat16), w3_ref[...],
                preferred_element_type=jnp.float32)
    a = a + b3_ref[...]
    # TODO(synk): max_action is baked in as a compile-time constant; move it to an
    # SMEM scalar if it must vary at runtime without recompiling.
    o_ref[...] = (max_action * jnp.tanh(a)).astype(o_ref.dtype)


def prepare_actor_params(params):
    """One-time prep: cast weights to bf16, pad the layer-1 contraction dim to a
    multiple of 32, and lane-pad layer 3's output to a multiple of 128."""
    state_dim, hidden = params["w1"].shape
    action_dim = params["w3"].shape[1]
    k_pad = _round_up(state_dim, _K_ALIGN)
    n_pad = _round_up(action_dim, _LANE)

    w1 = jnp.zeros((k_pad, hidden), jnp.float32)
    w1 = w1.at[:state_dim, :].set(params["w1"])
    w3 = jnp.zeros((params["w3"].shape[0], n_pad), jnp.float32)
    w3 = w3.at[:, :action_dim].set(params["w3"])
    b3 = jnp.zeros((1, n_pad), jnp.float32)
    b3 = b3.at[:, :action_dim].set(params["b3"])
    return {
        "w1": w1.astype(jnp.bfloat16),
        "b1": params["b1"].astype(jnp.float32),
        "w2": params["w2"].astype(jnp.bfloat16),
        "b2": params["b2"].astype(jnp.float32),
        "w3": w3.astype(jnp.bfloat16),
        "b3": b3,
        "state_dim": state_dim,
        "action_dim": action_dim,
    }


def _tile_plan(batch, block_rows):
    """Balanced batch tiling: equal-size tiles (multiple of 8 sublanes) with minimal
    padding.  Once the batch is big enough, force >= 2 and an even number of tiles so
    v7x's two TensorCores both do (equal) work; the one extra ~0.35 us grid step this
    costs on single-TC v5e/v6e is noise."""
    num_tiles = max(pl.cdiv(batch, block_rows), 1)
    if batch >= 2 * _SUBLANE:
        num_tiles = max(num_tiles, 2)
        if num_tiles % 2:
            num_tiles += 1
    tm = _round_up(pl.cdiv(batch, num_tiles), _SUBLANE)
    return tm, num_tiles * tm


def actor_forward(state, prepared, max_action, *, block_rows=512):
    """state: (B, state_dim) float32.  Returns (B, action_dim) float32 actions."""
    B, state_dim = state.shape
    assert state_dim == prepared["state_dim"]
    action_dim = prepared["action_dim"]
    k_pad = prepared["w1"].shape[0]
    n_pad = prepared["w3"].shape[1]

    tm, b_pad = _tile_plan(B, block_rows)
    # TODO(synk): for the tiny-batch rollout path (B <= 8), fuse this pad and the
    # final slice into the caller's jitted step (or accept pre-padded states) so they
    # don't become standalone HLO ops around an already overhead-bound kernel.
    state = jnp.pad(state, ((0, b_pad - B), (0, k_pad - state_dim)))

    kernel = functools.partial(_actor_kernel, max_action=float(max_action))

    def run(single_buffer):
        if single_buffer:
            # Constant index_map + single buffer: weights/biases are DMA'd once and
            # stay resident in VMEM across all grid steps (no redundant 2nd copy).
            resident = lambda a: pl.BlockSpec(a.shape, lambda i: (0, 0),
                                              pipeline_mode=pl.Buffered(1))
        else:
            resident = lambda a: pl.BlockSpec(a.shape, lambda i: (0, 0))
        return pl.pallas_call(
            kernel,
            out_shape=jax.ShapeDtypeStruct((b_pad, n_pad), jnp.float32),
            grid=(b_pad // tm,),
            in_specs=[
                pl.BlockSpec((tm, k_pad), lambda i: (i, 0)),
                resident(prepared["w1"]),
                resident(prepared["b1"]),
                resident(prepared["w2"]),
                resident(prepared["b2"]),
                resident(prepared["w3"]),
                resident(prepared["b3"]),
            ],
            out_specs=pl.BlockSpec((tm, n_pad), lambda i: (i, 0)),
            compiler_params=pltpu.CompilerParams(
                dimension_semantics=("parallel",)),
        )(state, prepared["w1"], prepared["b1"], prepared["w2"], prepared["b2"],
          prepared["w3"], prepared["b3"])

    try:
        out = run(single_buffer=True)
    except Exception:
        # Fallback for jax versions that reject BlockSpec(pipeline_mode=Buffered(1)).
        out = run(single_buffer=False)

    return out[:B, :action_dim]


def init_actor_params(key, state_dim, action_dim, hidden=256):
    """Deterministic init mimicking PyTorch nn.Linear default (uniform +-1/sqrt(fan_in)).
    Weights are stored transposed: (in_features, out_features)."""
    ks = jax.random.split(key, 6)

    def lin(kw, kb, fan_in, fan_out):
        bound = 1.0 / jnp.sqrt(jnp.float32(fan_in))
        w = jax.random.uniform(kw, (fan_in, fan_out), jnp.float32, -bound, bound)
        b = jax.random.uniform(kb, (1, fan_out), jnp.float32, -bound, bound)
        return w, b

    w1, b1 = lin(ks[0], ks[1], state_dim, hidden)
    w2, b2 = lin(ks[2], ks[3], hidden, hidden)
    w3, b3 = lin(ks[4], ks[5], hidden, action_dim)
    return {"w1": w1, "b1": b1, "w2": w2, "b2": b2, "w3": w3, "b3": b3}


def actor_reference(state, params, max_action):
    a = jnp.maximum(state @ params["w1"] + params["b1"], 0.0)
    a = jnp.maximum(a @ params["w2"] + params["b2"], 0.0)
    return max_action * jnp.tanh(a @ params["w3"] + params["b3"])


if __name__ == "__main__":
    key = jax.random.PRNGKey(0)
    k_state, k_params, k_big = jax.random.split(key, 3)

    batch, state_dim, action_dim, max_action = 2, 17, 6, 2.0
    params = init_actor_params(k_params, state_dim, action_dim)
    prepared = prepare_actor_params(params)

    # Small batch (per-env RL rollout shape): single 8-row tile.
    state = jax.random.normal(k_state, (batch, state_dim), jnp.float32)
    out = actor_forward(state, prepared, max_action)
    jax.block_until_ready(out)
    ref = actor_reference(state, params, max_action)
    assert out.shape == (batch, action_dim)
    assert jnp.allclose(out, ref, atol=2e-2, rtol=2e-2), "mismatch vs reference (B=2)"

    # Larger batch: exercises the balanced multi-tile grid (2 x 152 rows, b_pad=304).
    big_b = 300
    state_big = jax.random.normal(k_big, (big_b, state_dim), jnp.float32)
    out_big = actor_forward(state_big, prepared, max_action)
    jax.block_until_ready(out_big)
    ref_big = actor_reference(state_big, params, max_action)
    assert out_big.shape == (big_b, action_dim)
    assert jnp.allclose(out_big, ref_big, atol=2e-2, rtol=2e-2), "mismatch vs reference (B=300)"

    print("KERNEL_OK")
</pallas_src>

<mosaic_0001>
module attributes {stable_mosaic.version = 11 : i64} {
  func.func @_actor_kernel(%arg0: i32, %arg1: memref<8x32xf32, #tpu.memory_space<vmem>>, %arg2: memref<32x256xbf16, #tpu.memory_space<vmem>>, %arg3: memref<1x256xf32, #tpu.memory_space<vmem>>, %arg4: memref<256x256xbf16, #tpu.memory_space<vmem>>, %arg5: memref<1x256xf32, #tpu.memory_space<vmem>>, %arg6: memref<256x128xbf16, #tpu.memory_space<vmem>>, %arg7: memref<1x128xf32, #tpu.memory_space<vmem>>, %arg8: memref<8x128xf32, #tpu.memory_space<vmem>>) attributes {dimension_semantics = [#tpu.dimension_semantics<parallel>], iteration_bounds = array<i64: 1>, scalar_prefetch = 0 : i64, scratch_operands = 0 : i64, tpu.core_type = #tpu.core_type<tc>, window_params = [{transform_indices = @transform_0, window_bounds = array<i64: 8, 32>}, {pipeline_mode = #tpu.pipeline_mode<synchronous>, transform_indices = @transform_1, window_bounds = array<i64: 32, 256>}, {pipeline_mode = #tpu.pipeline_mode<synchronous>, transform_indices = @transform_2, window_bounds = array<i64: 1, 256>}, {pipeline_mode = #tpu.pipeline_mode<synchronous>, transform_indices = @transform_3, window_bounds = array<i64: 256, 256>}, {pipeline_mode = #tpu.pipeline_mode<synchronous>, transform_indices = @transform_4, window_bounds = array<i64: 1, 256>}, {pipeline_mode = #tpu.pipeline_mode<synchronous>, transform_indices = @transform_5, window_bounds = array<i64: 256, 128>}, {pipeline_mode = #tpu.pipeline_mode<synchronous>, transform_indices = @transform_6, window_bounds = array<i64: 1, 128>}, {transform_indices = @transform_7, window_bounds = array<i64: 8, 128>}]} {
    %c0 = arith.constant 0 : index
    %c0_0 = arith.constant 0 : index
    %0 = vector.load %arg1[%c0, %c0_0] : memref<8x32xf32, #tpu.memory_space<vmem>>, vector<8x32xf32>
    %1 = arith.truncf %0 : vector<8x32xf32> to vector<8x32xbf16>
    %c0_1 = arith.constant 0 : index
    %c0_2 = arith.constant 0 : index
    %2 = vector.load %arg2[%c0_1, %c0_2] : memref<32x256xbf16, #tpu.memory_space<vmem>>, vector<32x256xbf16>
    %cst = arith.constant dense<0.000000e+00> : vector<8x256xf32>
    %3 = tpu.matmul %1, %2, %cst {dimension_numbers = #tpu.dot_dimension_numbers<[1], [0], [0], [1], [0, 0, 1, 1], [], []>} : vector<8x32xbf16>, vector<32x256xbf16>, vector<8x256xf32> -> vector<8x256xf32>
    %c0_3 = arith.constant 0 : index
    %c0_4 = arith.constant 0 : index
    %4 = vector.load %arg3[%c0_3, %c0_4] : memref<1x256xf32, #tpu.memory_space<vmem>>, vector<1x256xf32>
    %5 = vector.broadcast %4 : vector<1x256xf32> to vector<8x256xf32>
    %6 = arith.addf %3, %5 : vector<8x256xf32>
    %cst_5 = arith.constant 0.000000e+00 : f32
    %7 = vector.broadcast %cst_5 : f32 to vector<8x256xf32>
    %8 = arith.maximumf %6, %7 : vector<8x256xf32>
    %9 = arith.truncf %8 : vector<8x256xf32> to vector<8x256xbf16>
    %c0_6 = arith.constant 0 : index
    %c0_7 = arith.constant 0 : index
    %10 = vector.load %arg4[%c0_6, %c0_7] : memref<256x256xbf16, #tpu.memory_space<vmem>>, vector<256x256xbf16>
    %cst_8 = arith.constant dense<0.000000e+00> : vector<8x256xf32>
    %11 = tpu.matmul %9, %10, %cst_8 {dimension_numbers = #tpu.dot_dimension_numbers<[1], [0], [0], [1], [0, 0, 1, 1], [], []>} : vector<8x256xbf16>, vector<256x256xbf16>, vector<8x256xf32> -> vector<8x256xf32>
    %c0_9 = arith.constant 0 : index
    %c0_10 = arith.constant 0 : index
    %12 = vector.load %arg5[%c0_9, %c0_10] : memref<1x256xf32, #tpu.memory_space<vmem>>, vector<1x256xf32>
    %13 = vector.broadcast %12 : vector<1x256xf32> to vector<8x256xf32>
    %14 = arith.addf %11, %13 : vector<8x256xf32>
    %cst_11 = arith.constant 0.000000e+00 : f32
    %15 = vector.broadcast %cst_11 : f32 to vector<8x256xf32>
    %16 = arith.maximumf %14, %15 : vector<8x256xf32>
    %17 = arith.truncf %16 : vector<8x256xf32> to vector<8x256xbf16>
    %c0_12 = arith.constant 0 : index
    %c0_13 = arith.constant 0 : index
    %18 = vector.load %arg6[%c0_12, %c0_13] : memref<256x128xbf16, #tpu.memory_space<vmem>>, vector<256x128xbf16>
    %cst_14 = arith.constant dense<0.000000e+00> : vector<8x128xf32>
    %19 = tpu.matmul %17, %18, %cst_14 {dimension_numbers = #tpu.dot_dimension_numbers<[1], [0], [0], [1], [0, 0, 1, 1], [], []>} : vector<8x256xbf16>, vector<256x128xbf16>, vector<8x128xf32> -> vector<8x128xf32>
    %c0_15 = arith.constant 0 : index
    %c0_16 = arith.constant 0 : index
    %20 = vector.load %arg7[%c0_15, %c0_16] : memref<1x128xf32, #tpu.memory_space<vmem>>, vector<1x128xf32>
    %21 = vector.broadcast %20 : vector<1x128xf32> to vector<8x128xf32>
    %22 = arith.addf %19, %21 : vector<8x128xf32>
    %23 = math.tanh %22 : vector<8x128xf32>
    %cst_17 = arith.constant 2.000000e+00 : f32
    %24 = vector.broadcast %cst_17 : f32 to vector<8x128xf32>
    %25 = arith.mulf %24, %23 : vector<8x128xf32>
    %c0_18 = arith.constant 0 : index
    %c0_19 = arith.constant 0 : index
    %26 = vector.load %arg8[%c0_18, %c0_19] : memref<8x128xf32, #tpu.memory_space<vmem>>, vector<8x128xf32>
    tpu.vector_store %arg8[%c0_18, %c0_19], %25 {strides = array<i32>} : memref<8x128xf32, #tpu.memory_space<vmem>>, vector<8x128xf32>,
    return
  }
  func.func @transform_0(%arg0: i32) -> (i32, i32) {
    %c0_i32 = arith.constant 0 : i32
    %c0_i32_0 = arith.constant 0 : i32
    return %arg0, %c0_i32 : i32, i32
  }
  func.func @transform_1(%arg0: i32) -> (i32, i32) {
    %c0_i32 = arith.constant 0 : i32
    %c0_i32_0 = arith.constant 0 : i32
    %c0_i32_1 = arith.constant 0 : i32
    return %c0_i32, %c0_i32_0 : i32, i32
  }
  func.func @transform_2(%arg0: i32) -> (i32, i32) {
    %c0_i32 = arith.constant 0 : i32
    %c0_i32_0 = arith.constant 0 : i32
    %c0_i32_1 = arith.constant 0 : i32
    return %c0_i32, %c0_i32_0 : i32, i32
  }
  func.func @transform_3(%arg0: i32) -> (i32, i32) {
    %c0_i32 = arith.constant 0 : i32
    %c0_i32_0 = arith.constant 0 : i32
    %c0_i32_1 = arith.constant 0 : i32
    return %c0_i32, %c0_i32_0 : i32, i32
  }
  func.func @transform_4(%arg0: i32) -> (i32, i32) {
    %c0_i32 = arith.constant 0 : i32
    %c0_i32_0 = arith.constant 0 : i32
    %c0_i32_1 = arith.constant 0 : i32
    return %c0_i32, %c0_i32_0 : i32, i32
  }
  func.func @transform_5(%arg0: i32) -> (i32, i32) {
    %c0_i32 = arith.constant 0 : i32
    %c0_i32_0 = arith.constant 0 : i32
    %c0_i32_1 = arith.constant 0 : i32
    return %c0_i32, %c0_i32_0 : i32, i32
  }
  func.func @transform_6(%arg0: i32) -> (i32, i32) {
    %c0_i32 = arith.constant 0 : i32
    %c0_i32_0 = arith.constant 0 : i32
    %c0_i32_1 = arith.constant 0 : i32
    return %c0_i32, %c0_i32_0 : i32, i32
  }
  func.func @transform_7(%arg0: i32) -> (i32, i32) {
    %c0_i32 = arith.constant 0 : i32
    %c0_i32_0 = arith.constant 0 : i32
    return %arg0, %c0_i32 : i32, i32
  }
}

module attributes {stable_mosaic.version = 11 : i64} {
  func.func @_actor_kernel(%arg0: i32, %arg1: memref<8x32xf32, #tpu.memory_space<vmem>>, %arg2: memref<32x256xbf16, #tpu.memory_space<vmem>>, %arg3: memref<1x256xf32, #tpu.memory_space<vmem>>, %arg4: memref<256x256xbf16, #tpu.memory_space<vmem>>, %arg5: memref<1x256xf32, #tpu.memory_space<vmem>>, %arg6: memref<256x128xbf16, #tpu.memory_space<vmem>>, %arg7: memref<1x128xf32, #tpu.memory_space<vmem>>, %arg8: memref<8x128xf32, #tpu.memory_space<vmem>>) attributes {dimension_semantics = [#tpu.dimension_semantics<parallel>], iteration_bounds = array<i64: 1>, scalar_prefetch = 0 : i64, scratch_operands = 0 : i64, tpu.core_type = #tpu.core_type<tc>, window_params = [{transform_indices = @transform_0, window_bounds = array<i64: 8, 32>}, {pipeline_mode = #tpu.pipeline_mode<synchronous>, transform_indices = @transform_1, window_bounds = array<i64: 32, 256>}, {pipeline_mode = #tpu.pipeline_mode<synchronous>, transform_indices = @transform_2, window_bounds = array<i64: 1, 256>}, {pipeline_mode = #tpu.pipeline_mode<synchronous>, transform_indices = @transform_3, window_bounds = array<i64: 256, 256>}, {pipeline_mode = #tpu.pipeline_mode<synchronous>, transform_indices = @transform_4, window_bounds = array<i64: 1, 256>}, {pipeline_mode = #tpu.pipeline_mode<synchronous>, transform_indices = @transform_5, window_bounds = array<i64: 256, 128>}, {pipeline_mode = #tpu.pipeline_mode<synchronous>, transform_indices = @transform_6, window_bounds = array<i64: 1, 128>}, {transform_indices = @transform_7, window_bounds = array<i64: 8, 128>}]} {
    %c0 = arith.constant 0 : index
    %c0_0 = arith.constant 0 : index
    %0 = vector.load %arg1[%c0, %c0_0] : memref<8x32xf32, #tpu.memory_space<vmem>>, vector<8x32xf32>
    %1 = arith.truncf %0 : vector<8x32xf32> to vector<8x32xbf16>
    %c0_1 = arith.constant 0 : index
    %c0_2 = arith.constant 0 : index
    %2 = vector.load %arg2[%c0_1, %c0_2] : memref<32x256xbf16, #tpu.memory_space<vmem>>, vector<32x256xbf16>
    %cst = arith.constant dense<0.000000e+00> : vector<8x256xf32>
    %3 = tpu.matmul %1, %2, %cst {dimension_numbers = #tpu.dot_dimension_numbers<[1], [0], [0], [1], [0, 0, 1, 1], [], []>} : vector<8x32xbf16>, vector<32x256xbf16>, vector<8x256xf32> -> vector<8x256xf32>
    %c0_3 = arith.constant 0 : index
    %c0_4 = arith.constant 0 : index
    %4 = vector.load %arg3[%c0_3, %c0_4] : memref<1x256xf32, #tpu.memory_space<vmem>>, vector<1x256xf32>
    %5 = vector.broadcast %4 : vector<1x256xf32> to vector<8x256xf32>
    %6 = arith.addf %3, %5 : vector<8x256xf32>
    %cst_5 = arith.constant 0.000000e+00 : f32
    %7 = vector.broadcast %cst_5 : f32 to vector<8x256xf32>
    %8 = arith.maximumf %6, %7 : vector<8x256xf32>
    %9 = arith.truncf %8 : vector<8x256xf32> to vector<8x256xbf16>
    %c0_6 = arith.constant 0 : index
    %c0_7 = arith.constant 0 : index
    %10 = vector.load %arg4[%c0_6, %c0_7] : memref<256x256xbf16, #tpu.memory_space<vmem>>, vector<256x256xbf16>
    %cst_8 = arith.constant dense<0.000000e+00> : vector<8x256xf32>
    %11 = tpu.matmul %9, %10, %cst_8 {dimension_numbers = #tpu.dot_dimension_numbers<[1], [0], [0], [1], [0, 0, 1, 1], [], []>} : vector<8x256xbf16>, vector<256x256xbf16>, vector<8x256xf32> -> vector<8x256xf32>
    %c0_9 = arith.constant 0 : index
    %c0_10 = arith.constant 0 : index
    %12 = vector.load %arg5[%c0_9, %c0_10] : memref<1x256xf32, #tpu.memory_space<vmem>>, vector<1x256xf32>
    %13 = vector.broadcast %12 : vector<1x256xf32> to vector<8x256xf32>
    %14 = arith.addf %11, %13 : vector<8x256xf32>
    %cst_11 = arith.constant 0.000000e+00 : f32
    %15 = vector.broadcast %cst_11 : f32 to vector<8x256xf32>
    %16 = arith.maximumf %14, %15 : vector<8x256xf32>
    %17 = arith.truncf %16 : vector<8x256xf32> to vector<8x256xbf16>
    %c0_12 = arith.constant 0 : index
    %c0_13 = arith.constant 0 : index
    %18 = vector.load %arg6[%c0_12, %c0_13] : memref<256x128xbf16, #tpu.memory_space<vmem>>, vector<256x128xbf16>
    %cst_14 = arith.constant dense<0.000000e+00> : vector<8x128xf32>
    %19 = tpu.matmul %17, %18, %cst_14 {dimension_numbers = #tpu.dot_dimension_numbers<[1], [0], [0], [1], [0, 0, 1, 1], [], []>} : vector<8x256xbf16>, vector<256x128xbf16>, vector<8x128xf32> -> vector<8x128xf32>
    %c0_15 = arith.constant 0 : index
    %c0_16 = arith.constant 0 : index
    %20 = vector.load %arg7[%c0_15, %c0_16] : memref<1x128xf32, #tpu.memory_space<vmem>>, vector<1x128xf32>
    %21 = vector.broadcast %20 : vector<1x128xf32> to vector<8x128xf32>
    %22 = arith.addf %19, %21 : vector<8x128xf32>
    %23 = math.tanh %22 : vector<8x128xf32>
    %cst_17 = arith.constant 2.000000e+00 : f32
    %24 = vector.broadcast %cst_17 : f32 to vector<8x128xf32>
    %25 = arith.mulf %24, %23 : vector<8x128xf32>
    %c0_18 = arith.constant 0 : index
    %c0_19 = arith.constant 0 : index
    %26 = vector.load %arg8[%c0_18, %c0_19] : memref<8x128xf32, #tpu.memory_space<vmem>>, vector<8x128xf32>
    tpu.vector_store %arg8[%c0_18, %c0_19], %25 {strides = array<i32>} : memref<8x128xf32, #tpu.memory_space<vmem>>, vector<8x128xf32>,
    return
  }
  func.func @transform_0(%arg0: i32) -> (i32, i32) {
    %c0_i32 = arith.constant 0 : i32
    %c0_i32_0 = arith.constant 0 : i32
    return %arg0, %c0_i32 : i32, i32
  }
  func.func @transform_1(%arg0: i32) -> (i32, i32) {
    %c0_i32 = arith.constant 0 : i32
    %c0_i32_0 = arith.constant 0 : i32
    %c0_i32_1 = arith.constant 0 : i32
    return %c0_i32, %c0_i32_0 : i32, i32
  }
  func.func @transform_2(%arg0: i32) -> (i32, i32) {
    %c0_i32 = arith.constant 0 : i32
    %c0_i32_0 = arith.constant 0 : i32
    %c0_i32_1 = arith.constant 0 : i32
    return %c0_i32, %c0_i32_0 : i32, i32
  }
  func.func @transform_3(%arg0: i32) -> (i32, i32) {
    %c0_i32 = arith.constant 0 : i32
    %c0_i32_0 = arith.constant 0 : i32
    %c0_i32_1 = arith.constant 0 : i32
    return %c0_i32, %c0_i32_0 : i32, i32
  }
  func.func @transform_4(%arg0: i32) -> (i32, i32) {
    %c0_i32 = arith.constant 0 : i32
    %c0_i32_0 = arith.constant 0 : i32
    %c0_i32_1 = arith.constant 0 : i32
    return %c0_i32, %c0_i32_0 : i32, i32
  }
  func.func @transform_5(%arg0: i32) -> (i32, i32) {
    %c0_i32 = arith.constant 0 : i32
    %c0_i32_0 = arith.constant 0 : i32
    %c0_i32_1 = arith.constant 0 : i32
    return %c0_i32, %c0_i32_0 : i32, i32
  }
  func.func @transform_6(%arg0: i32) -> (i32, i32) {
    %c0_i32 = arith.constant 0 : i32
    %c0_i32_0 = arith.constant 0 : i32
    %c0_i32_1 = arith.constant 0 : i32
    return %c0_i32, %c0_i32_0 : i32, i32
  }
  func.func @transform_7(%arg0: i32) -> (i32, i32) {
    %c0_i32 = arith.constant 0 : i32
    %c0_i32_0 = arith.constant 0 : i32
    return %arg0, %c0_i32 : i32, i32
  }
}

</mosaic_0001>

<bundles_post_ra>
// kernel: tpu_custom_call.1
= control target key start
LH: loop header
LB: loop body
LE: loop exit
PB: predicated region body
PF: predicated region fallthrough
CT: control target
= control target key end

     0   :  { %12 = vsyncpa [#allocation3], 0  ;;  %s1013_s0 = inlined_call_operand.hbm [shape: f32[8,32], index: 0, kind: input, shape index: {}]   ;;  %s1014_s1 = inlined_call_operand.hbm [shape: bf16[32,256], index: 1, kind: input, shape index: {}]   ;;  %s1015_s2 = inlined_call_operand.vmem [shape: f32[1,256], index: 2, kind: input, shape index: {}]   ;;  %s1016_s3 = inlined_call_operand.hbm [shape: bf16[256,256], index: 3, kind: input, shape index: {}]   ;;  %s1017_s4 = inlined_call_operand.vmem [shape: f32[1,256], index: 4, kind: input, shape index: {}]   ;;  %s1018_s5 = inlined_call_operand.hbm [shape: bf16[256,128], index: 5, kind: input, shape index: {}]   ;;  %s1019_s6 = inlined_call_operand.vmem [shape: f32[1,128], index: 6, kind: input, shape index: {}]   ;;  %s1020_s7 = inlined_call_operand.hbm [shape: f32[8,128], index: 7, kind: output, shape index: {}]  }
   0x1   :  { %13 = vsyncpa [#allocation6], 0 }
   0x2   :  { %14 = vsyncpa [#allocation9], 0 }
   0x3   :  { %15 = vsyncpa [#allocation4], 0  ;;  %s888_s24 = smov [#allocation5]   ;;  %s770_s28 = scalar_lea.hbm %s1014_s1, 512 }
   0x4   :  { %s31_s25 = sshll.u32 %s888_s24, 4  ;;  %p771_p0 = scmp.ne.s32.totalorder %s1014_s1, %s770_s28  ;;  %s32_s25 = int_to_ptr.vmem [resolvable:$true] %s31_s25 }
   0x5   :  { %p774_p1 = scmp.lt.u32.totalorder %s770_s28, %s1014_s1 }
   0x7   :  { %p776_p2 = pnand %p774_p1, %p771_p0 }
   0x9   :  { %779 = shalt.err (!%p776_p2)
}
   0xa   :  { %s780_s10 = scalar_lea.vmem %s32_s25, 512  ;;  %p785_p4 = scmp.lt.s32.totalorder %s32_s25, %s32_s25 }
   0xb   :  { %p781_p3 = scmp.ne.s32.totalorder %s32_s25, %s780_s10  ;;  %p786_p5 = scmp.lt.s32.totalorder %s780_s10, %s780_s10 }
   0xd   :  { %p787_p6 = por %p786_p5, %p785_p4 }
   0xf   :  { %p788_p7 = pnand %p787_p6, %p781_p3 }
  0x11   :  { %791 = shalt.err (!%p788_p7)
}
  0x12   :  { %s889_s11 = smov 128   ;;  %s890_s12 = smov 8  }
  0x13   :  { %37 = dma.hbm_to_vmem [thread:$0]  %s1014_s1, 512, %s32_s25, [#allocation6], %s889_s11, %s889_s11, %s890_s12  }
  0x14   :  { %s891_s15 = smov [#allocation2]   ;;  %s892_s17 = smov [#allocation7]  }
  0x15   :  { %s22_s16 = sshll.u32 %s891_s15, 4  ;;  %s45_s18 = sshll.u32 %s892_s17, 4  ;;  %s23_s16 = int_to_ptr.vmem [resolvable:$true] %s22_s16  ;;  %s46_s18 = int_to_ptr.vmem [resolvable:$true] %s45_s18 }
  0x16   :  { %s792_s21 = scalar_lea.hbm %s1013_s0, 128 }
  0x17   :  { %p793_p8 = scmp.ne.s32.totalorder %s1013_s0, %s792_s21  ;;  %p796_p9 = scmp.lt.u32.totalorder %s792_s21, %s1013_s0 }
  0x19   :  { %p798_p10 = pnand %p796_p9, %p793_p8 }
  0x1b   :  { %801 = shalt.err (!%p798_p10)
}
  0x1c   :  { %s802_s1 = scalar_lea.vmem %s23_s16, 128  ;;  %p807_p12 = scmp.lt.s32.totalorder %s23_s16, %s23_s16 }
  0x1d   :  { %p803_p11 = scmp.ne.s32.totalorder %s23_s16, %s802_s1  ;;  %p808_p13 = scmp.lt.s32.totalorder %s802_s1, %s802_s1 }
  0x1f   :  { %p809_p0 = por %p808_p13, %p807_p12 }
  0x21   :  { %p810_p1 = pnand %p809_p0, %p803_p11 }
  0x23   :  { %813 = shalt.err (!%p810_p1)
}
  0x24   :  { %25 = dma.hbm_to_vmem [thread:$0]  %s1013_s0, 128, %s23_s16, [#allocation3]  }
  0x25   :  { %s814_s30 = scalar_lea.hbm %s1016_s3, 4096 }
  0x26   :  { %p815_p2 = scmp.ne.s32.totalorder %s1016_s3, %s814_s30  ;;  %p818_p3 = scmp.lt.u32.totalorder %s814_s30, %s1016_s3 }
  0x28   :  { %p820_p4 = pnand %p818_p3, %p815_p2 }
  0x2a   :  { %823 = shalt.err (!%p820_p4)
}
  0x2b   :  { %s824_s14 = scalar_lea.vmem %s46_s18, 4096  ;;  %p829_p6 = scmp.lt.s32.totalorder %s46_s18, %s46_s18 }
  0x2c   :  { %p825_p5 = scmp.ne.s32.totalorder %s46_s18, %s824_s14  ;;  %p830_p7 = scmp.lt.s32.totalorder %s824_s14, %s824_s14 }
  0x2e   :  { %p831_p8 = por %p830_p7, %p829_p6 }
  0x30   :  { %p832_p9 = pnand %p831_p8, %p825_p5 }
  0x32   :  { %835 = shalt.err (!%p832_p9)
}
  0x33   :  { %51 = dma.hbm_to_vmem [thread:$0]  %s1016_s3, 4096, %s46_s18, [#allocation6], %s889_s11, %s889_s11, %s890_s12  }
  0x34   :  { %s893_s16 = smov [#allocation8]   ;;  %s836_s21 = scalar_lea.hbm %s1018_s5, 2048 }
  0x35   :  { %s59_s17 = sshll.u32 %s893_s16, 4  ;;  %p837_p10 = scmp.ne.s32.totalorder %s1018_s5, %s836_s21  ;;  %s60_s17 = int_to_ptr.vmem [resolvable:$true] %s59_s17 }
  0x36   :  { %p840_p11 = scmp.lt.u32.totalorder %s836_s21, %s1018_s5 }
  0x38   :  { %p842_p12 = pnand %p840_p11, %p837_p10 }
  0x3a   :  { %845 = shalt.err (!%p842_p12)
}
  0x3b   :  { %s846_s1 = scalar_lea.vmem %s60_s17, 2048  ;;  %p851_p0 = scmp.lt.s32.totalorder %s60_s17, %s60_s17 }
  0x3c   :  { %p847_p13 = scmp.ne.s32.totalorder %s60_s17, %s846_s1  ;;  %p852_p1 = scmp.lt.s32.totalorder %s846_s1, %s846_s1 }
  0x3e   :  { %p853_p2 = por %p852_p1, %p851_p0 }
  0x40   :  { %p854_p3 = pnand %p853_p2, %p847_p13 }
  0x42   :  { %857 = shalt.err (!%p854_p3)
}
  0x43   :  { %s894_s3 = smov 64   ;;  %s895_s11 = smov 4  }
  0x44   :  { %65 = dma.hbm_to_vmem [thread:$0]  %s1018_s5, 2048, %s60_s17, [#allocation9], %s894_s3, %s894_s3, %s895_s11  }
  0x45   :  { %880 = dma.done.wait [#allocation3], 128  }
  0x46   :  { %881 = vsyncadd [#allocation3], 4294967168 }
  0x47   :  { %882 = dma.done.wait [#allocation6], 4608  }
  0x48   :  { %883 = vsyncadd [#allocation6], 4294962688 }
  0x49   :  { %884 = dma.done.wait [#allocation9], 2048  }
  0x4a   :  { %885 = vsyncadd [#allocation9], 4294965248  ;;  %v896_v0 = vmov 0   ;;  %v698_v1 = vld [vmem:[#allocation5 + $0x4] ss:$8 sps:$4 sm:$0xff]   ;;  %v81_v5 = vld [vmem:[#allocation2] sm:$0xff]  ;;  %v89_v51 = vlaneseq }
  0x4b   :  { %155 = vmatprep.mubr.bf16.mxu0 %v896_v0  ;;  %v700_v2 = vld [vmem:[#allocation5] ss:$8 sps:$4 sm:$0xff]   ;;  %123 = vmatprep.subr.bf16.mxu0 %v698_v1  ;;  %v701_v3 = vld [vmem:[#allocation5 + $0x14] ss:$8 sps:$4 sm:$0xff]   ;;  %v703_v4 = vld [vmem:[#allocation5 + $0x10] ss:$8 sps:$4 sm:$0xff]   ;;  %v82_v9 = vpack.c.bf16 %v81_v5, %v81_v5 }
  0x4c   :  { %124 = vmatpush1.bf16.msra.mxu0 %v700_v2  ;;  %v704_v6 = vld [vmem:[#allocation7 + $0x4] ss:$8 sps:$4 sm:$0xff]   ;;  %v706_v7 = vld [vmem:[#allocation7] ss:$8 sps:$4 sm:$0xff]   ;;  %v707_v8 = vld [vmem:[#allocation7 + $0x14] ss:$8 sps:$4 sm:$0xff]  }
  0x4d   :  { %125 = vmatprep.subr.bf16.mxu0 %v701_v3  ;;  %372 = vmatprep.subr.bf16.mxu1 %v704_v6  ;;  %v709_v10 = vld [vmem:[#allocation7 + $0x10] ss:$8 sps:$4 sm:$0xff]   ;;  %vm119_vm0 = vcmask 261120   ;;  %v710_v11 = vld [vmem:[#allocation7 + $0x24] ss:$8 sps:$4 sm:$0xff]   ;;  %v90_v52 = vshrl.u32 %v89_v51, 7 }
  0x4e   :  { %373 = vmatpush1.bf16.msra.mxu1 %v706_v7  ;;  %v712_v12 = vld [vmem:[#allocation7 + $0x20] ss:$8 sps:$4 sm:$0xff]   ;;  %v713_v13 = vld [vmem:[#allocation7 + $0x34] ss:$8 sps:$4 sm:$0xff]   ;;  %v715_v14 = vld [vmem:[#allocation7 + $0x30] ss:$8 sps:$4 sm:$0xff]  }
  0x4f   :  { %374 = vmatprep.subr.bf16.mxu1 %v707_v8  ;;  %v716_v15 = vld [vmem:[#allocation7 + $0x44] ss:$8 sps:$4 sm:$0xff]   ;;  %v718_v16 = vld [vmem:[#allocation7 + $0x40] ss:$8 sps:$4 sm:$0xff]   ;;  %v719_v17 = vld [vmem:[#allocation7 + $0x54] ss:$8 sps:$4 sm:$0xff]  }
  0x50   :  { %126 = vmatpush1.bf16.msra.mxu0 %v703_v4  ;;  %v721_v18 = vld [vmem:[#allocation7 + $0x50] ss:$8 sps:$4 sm:$0xff]   ;;  %v722_v19 = vld [vmem:[#allocation7 + $0x64] ss:$8 sps:$4 sm:$0xff]   ;;  %v724_v20 = vld [vmem:[#allocation7 + $0x60] ss:$8 sps:$4 sm:$0xff]  }
  0x51   :  { %v725_v21 = vld [vmem:[#allocation7 + $0x74] ss:$8 sps:$4 sm:$0xff]   ;;  %v727_v22 = vld [vmem:[#allocation7 + $0x70] ss:$8 sps:$4 sm:$0xff]   ;;  %v728_v23 = vld [vmem:[#allocation7 + $0x84] ss:$8 sps:$4 sm:$0xff]  }
  0x52   :  { %375 = vmatpush1.bf16.msra.mxu1 %v709_v10  ;;  %v730_v24 = vld [vmem:[#allocation7 + $0x80] ss:$8 sps:$4 sm:$0xff]   ;;  %v731_v25 = vld [vmem:[#allocation7 + $0x94] ss:$8 sps:$4 sm:$0xff]   ;;  %v733_v26 = vld [vmem:[#allocation7 + $0x90] ss:$8 sps:$4 sm:$0xff]  }
  0x53   :  { %616 = vmatmul.mubr.msk.bf16.vlgmr.msra.gmra.mrb[0].mxu0 %vm119_vm0, %v82_v9  ;;  %376 = vmatprep.subr.bf16.mxu1 %v710_v11  ;;  %v734_v27 = vld [vmem:[#allocation7 + $0xa4] ss:$8 sps:$4 sm:$0xff]   ;;  %v736_v28 = vld [vmem:[#allocation7 + $0xa0] ss:$8 sps:$4 sm:$0xff]   ;;  %v737_v29 = vld [vmem:[#allocation7 + $0xb4] ss:$8 sps:$4 sm:$0xff]  }
  0x54   :  { %v739_v30 = vld [vmem:[#allocation7 + $0xb0] ss:$8 sps:$4 sm:$0xff]   ;;  %v740_v31 = vld [vmem:[#allocation7 + $0xc4] ss:$8 sps:$4 sm:$0xff]   ;;  %v742_v32 = vld [vmem:[#allocation7 + $0xc0] ss:$8 sps:$4 sm:$0xff]  }
  0x55   :  { %v743_v33 = vld [vmem:[#allocation7 + $0xd4] ss:$8 sps:$4 sm:$0xff]   ;;  %v745_v34 = vld [vmem:[#allocation7 + $0xd0] ss:$8 sps:$4 sm:$0xff]   ;;  %v746_v35 = vld [vmem:[#allocation7 + $0xe4] ss:$8 sps:$4 sm:$0xff]  }
  0x56   :  { %377 = vmatpush1.bf16.msra.mxu1 %v712_v12  ;;  %v748_v36 = vld [vmem:[#allocation7 + $0xe0] ss:$8 sps:$4 sm:$0xff]   ;;  %v749_v37 = vld [vmem:[#allocation7 + $0xf4] ss:$8 sps:$4 sm:$0xff]   ;;  %v751_v38 = vld [vmem:[#allocation7 + $0xf0] ss:$8 sps:$4 sm:$0xff]  }
  0x57   :  { %378 = vmatprep.subr.bf16.mxu1 %v713_v13  ;;  %v752_v39 = vld [vmem:[#allocation8 + $0x40] sm:$0xff]   ;;  %v754_v41 = vld [vmem:[#allocation8 + $0x48] sm:$0xff]   ;;  %v756_v43 = vld [vmem:[#allocation8 + $0x50] sm:$0xff]   ;;  %v91_v53 = vsub.s32 0, %v90_v52  ;;  %v95_v55 = vsub.s32 1, %v90_v52 }
  0x58   :  { %v753_v40 = vld [vmem:[#allocation8] sm:$0xff]   ;;  %666 = vmatprep.subr.bf16.mxu0 %v752_v39  ;;  %v755_v42 = vld [vmem:[#allocation8 + $0x8] sm:$0xff]   ;;  %v757_v44 = vld [vmem:[#allocation8 + $0x10] sm:$0xff]  }
  0x59   :  { %667 = vmatpush3.bf16.msra.mxu0 %v753_v40  ;;  %v758_v45 = vld [vmem:[#allocation8 + $0x58] sm:$0xff]   ;;  %v760_v47 = vld [vmem:[#allocation8 + $0x60] sm:$0xff]   ;;  %v762_v49 = vld [vmem:[#allocation8 + $0x68] sm:$0xff]  }
  0x5a   :  { %379 = vmatpush1.bf16.msra.mxu1 %v715_v14  ;;  %668 = vmatprep.subr.bf16.mxu0 %v754_v41  ;;  %v759_v46 = vld [vmem:[#allocation8 + $0x18] sm:$0xff]   ;;  %v761_v48 = vld [vmem:[#allocation8 + $0x20] sm:$0xff]   ;;  %v763_v50 = vld [vmem:[#allocation8 + $0x28] sm:$0xff]  }
  0x5b   :  { %380 = vmatprep.subr.bf16.mxu1 %v716_v15  ;;  %v87_v54 = vld [vmem:[%s1015_s2] sm:$0x3]  ;;  %v764_v4 = vld [vmem:[#allocation8 + $0x70] sm:$0xff]  }
  0x5c   :  { %v92_v56 = vrot.slane %v87_v54, %v91_v53  ;;  %v96_v57 = vrot.slane %v87_v54, %v95_v55  ;;  %v765_v5 = vld [vmem:[#allocation8 + $0x30] sm:$0xff]   ;;  %v766_v6 = vld [vmem:[#allocation8 + $0x78] sm:$0xff]  }
  0x5d   :  { %669 = vmatpush3.bf16.msra.mxu0 %v755_v42  ;;  %v767_v7 = vld [vmem:[#allocation8 + $0x38] sm:$0xff]  }
  0x5e   :  { %381 = vmatpush1.bf16.msra.mxu1 %v718_v16  ;;  %670 = vmatprep.subr.bf16.mxu0 %v756_v43  ;;  %v200_v8 = vld [vmem:[%s1017_s4] sm:$0x3]  ;;  %s897_s4 = smov [#allocation10]  }
  0x5f   :  { %382 = vmatprep.subr.bf16.mxu1 %v719_v17  ;;  %v205_v9 = vrot.slane %v200_v8, %v91_v53  ;;  %v209_v10 = vrot.slane %v200_v8, %v95_v55  ;;  %s601_s30 = sshll.u32 %s897_s4, 4  ;;  %s602_s30 = int_to_ptr.vmem [resolvable:$true] %s601_s30 }
  0x60   :  { %s858_s8 = scalar_lea.vmem %s602_s30, 128  ;;  %p863_p5 = scmp.lt.s32.totalorder %s602_s30, %s602_s30 }
  0x61   :  { %671 = vmatpush3.bf16.msra.mxu0 %v757_v44  ;;  %p859_p4 = scmp.ne.s32.totalorder %s602_s30, %s858_s8  ;;  %p864_p6 = scmp.lt.s32.totalorder %s858_s8, %s858_s8 }
  0x62   :  { %383 = vmatpush1.bf16.msra.mxu1 %v721_v18  ;;  %672 = vmatprep.subr.bf16.mxu0 %v758_v45 }
  0x63   :  { %384 = vmatprep.subr.bf16.mxu1 %v722_v19  ;;  %p865_p7 = por %p864_p6, %p863_p5 }
  0x65   :  { %673 = vmatpush3.bf16.msra.mxu0 %v759_v46  ;;  %p866_p8 = pnand %p865_p7, %p859_p4 }
  0x66   :  { %385 = vmatpush1.bf16.msra.mxu1 %v724_v20  ;;  %674 = vmatprep.subr.bf16.mxu0 %v760_v47 }
  0x67   :  { %386 = vmatprep.subr.bf16.mxu1 %v725_v21 }
  0x69   :  { %675 = vmatpush3.bf16.msra.mxu0 %v761_v48 }
  0x6a   :  { %387 = vmatpush1.bf16.msra.mxu1 %v727_v22  ;;  %676 = vmatprep.subr.bf16.mxu0 %v762_v49  ;;  %v649_v22 = vld [vmem:[%s1019_s6] ss:$0 sm:$0xff] }
  0x6b   :  { %388 = vmatprep.subr.bf16.mxu1 %v728_v23 }
  0x6d   :  { %677 = vmatpush3.bf16.msra.mxu0 %v763_v50 }
  0x6e   :  { %389 = vmatpush1.bf16.msra.mxu1 %v730_v24  ;;  %678 = vmatprep.subr.bf16.mxu0 %v764_v4 }
  0x6f   :  { %390 = vmatprep.subr.bf16.mxu1 %v731_v25 }
  0x71   :  { %679 = vmatpush3.bf16.msra.mxu0 %v765_v5 }
  0x72   :  { %391 = vmatpush1.bf16.msra.mxu1 %v733_v26  ;;  %680 = vmatprep.subr.bf16.mxu0 %v766_v6 }
  0x73   :  { %392 = vmatprep.subr.bf16.mxu1 %v734_v27 }
  0x75   :  { %681 = vmatpush3.bf16.msra.mxu0 %v767_v7 }
  0x76   :  { %393 = vmatpush1.bf16.msra.mxu1 %v736_v28 }
  0x77   :  { %394 = vmatprep.subr.bf16.mxu1 %v737_v29 }
  0x7a   :  { %395 = vmatpush1.bf16.msra.mxu1 %v739_v30 }
  0x7b   :  { %396 = vmatprep.subr.bf16.mxu1 %v740_v31 }
  0x7e   :  { %397 = vmatpush1.bf16.msra.mxu1 %v742_v32 }
  0x7f   :  { %398 = vmatprep.subr.bf16.mxu1 %v743_v33 }
  0x82   :  { %399 = vmatpush1.bf16.msra.mxu1 %v745_v34 }
  0x83   :  { %400 = vmatprep.subr.bf16.mxu1 %v746_v35 }
  0x86   :  { %401 = vmatpush1.bf16.msra.mxu1 %v748_v36 }
  0x87   :  { %402 = vmatprep.subr.bf16.mxu1 %v749_v37 }
  0x8a   :  { %403 = vmatpush1.bf16.msra.mxu1 %v751_v38 }
 0x126   :  { %v157_v58 = vpop.f32.mrb[0].mxu0 }
 0x127   :  { %v158_v59 = vadd.f32 %v157_v58, %v92_v56  ;;  %v159_v60 = vpop.f32.mrb[1].mxu0 }
 0x128   :  { %v160_v61 = vadd.f32 %v159_v60, %v96_v57  ;;  %v161_v62 = vpop.f32.mrb[2].mxu0 }
 0x129   :  { %v164_v63 = vmax.f32 %v158_v59, 0.0  ;;  %v162_v0 = vpop.f32.mrb[3].mxu0 }
 0x12a   :  { %v165_v1 = vmax.f32 %v160_v61, 0.0 }
 0x12b   :  { %v166_v3 = vpack.c.bf16 %v164_v63, %v164_v63 }
 0x12c   :  { %v167_v2 = vpack.c.bf16 %v165_v1, %v165_v1 }
 0x12e   :  { %404 = vmatprep.mubr.bf16.mxu1 %v167_v2 }
 0x12f   :  { %405 = vmatmul.mubr.bf16.vlgmr.msra.gmra.mrb[0].mxu1 %v166_v3 }
 0x202   :  { %v406_v11 = vpop.f32.mrb[0].mxu1 }
 0x203   :  { %v407_v12 = vadd.f32 %v406_v11, %v205_v9  ;;  %v408_v13 = vpop.f32.mrb[1].mxu1 }
 0x204   :  { %v409_v14 = vadd.f32 %v408_v13, %v209_v10  ;;  %v410_v15 = vpop.f32.mrb[2].mxu1 }
 0x205   :  { %v413_v16 = vmax.f32 %v407_v12, 0.0  ;;  %v411_v17 = vpop.f32.mrb[3].mxu1 }
 0x206   :  { %v414_v18 = vmax.f32 %v409_v14, 0.0 }
 0x207   :  { %v415_v20 = vpack.c.bf16 %v413_v16, %v413_v16 }
 0x208   :  { %v416_v19 = vpack.c.bf16 %v414_v18, %v414_v18 }
 0x20a   :  { %584 = vmatprep.mubr.bf16.mxu0 %v416_v19 }
 0x20b   :  { %585 = vmatmul.mubr.bf16.vlgmr.msra.gmra.mrb[4].mxu0 %v415_v20 }
 0x2de   :  { %v682_v21 = vpop.f32.mrb[4].mxu0 }
 0x2df   :  { %v683_v23 = vpop.f32.mrb[5].mxu0 }
 0x2e0   :  { %v684_v24 = vadd.f32 %v683_v23, %v682_v21  ;;  %v685_v25 = vpop.f32.mrb[6].mxu0 }
 0x2e1   :  { %v686_v26 = vpop.f32.mrb[7].mxu0 }
 0x2e2   :  { %v587_v27 = vadd.f32 %v684_v24, %v649_v22 }
 0x2e4   :  { %768 = vtanh.f32 %v587_v27 }
 0x2ee   :  { %v769_v28 = vpop.eup %768 }
 0x2ef   :  { %v593_v29 = vmul.f32 2.0, %v769_v28 }
 0x2f1   :  { %594 = vst [vmem:[#allocation10] sm:$0xff] %v593_v29 }
 0x2f2   :  { %869 = shalt.err (!%p866_p8)
}
 0x2f3   :  { %s870_s10 = scalar_lea.hbm %s1020_s7, 128 }
 0x2f4   :  { %p871_p9 = scmp.ne.s32.totalorder %s1020_s7, %s870_s10  ;;  %p874_p10 = scmp.lt.u32.totalorder %s870_s10, %s1020_s7 }
 0x2f6   :  { %p876_p11 = pnand %p874_p10, %p871_p9 }
 0x2f8   :  { %879 = shalt.err (!%p876_p11)
}
 0x2f9   :  { %604 = dma.vmem_to_hbm [thread:$0]  %s602_s30, 128, %s1020_s7, [#allocation4]  }
 0x2fa   :  { %886 = dma.done.wait [#allocation4], 128  }
 0x2fb   :  { %887 = vsyncadd [#allocation4], 4294967168 }
 0x2fc   :  { %608 = vsyncpa [#allocation3], 1 }
 0x2fd   :  { %609 = vsyncpa [#allocation6], 1 }
 0x2fe   :  { %610 = vsyncpa [#allocation9], 1 }
 0x2ff   :  { %611 = vsyncpa [#allocation4], 1 }

// kernel: tpu_custom_call.1
= control target key start
LH: loop header
LB: loop body
LE: loop exit
PB: predicated region body
PF: predicated region fallthrough
CT: control target
= control target key end

     0   :  { %12 = vsyncpa [#allocation3], 0  ;;  %s1013_s0 = inlined_call_operand.hbm [shape: f32[8,32], index: 0, kind: input, shape index: {}]   ;;  %s1014_s1 = inlined_call_operand.hbm [shape: bf16[32,256], index: 1, kind: input, shape index: {}]   ;;  %s1015_s2 = inlined_call_operand.vmem [shape: f32[1,256], index: 2, kind: input, shape index: {}]   ;;  %s1016_s3 = inlined_call_operand.hbm [shape: bf16[256,256], index: 3, kind: input, shape index: {}]   ;;  %s1017_s4 = inlined_call_operand.vmem [shape: f32[1,256], index: 4, kind: input, shape index: {}]   ;;  %s1018_s5 = inlined_call_operand.hbm [shape: bf16[256,128], index: 5, kind: input, shape index: {}]   ;;  %s1019_s6 = inlined_call_operand.vmem [shape: f32[1,128], index: 6, kind: input, shape index: {}]   ;;  %s1020_s7 = inlined_call_operand.hbm [shape: f32[8,128], index: 7, kind: output, shape index: {}]  }
   0x1   :  { %13 = vsyncpa [#allocation6], 0 }
   0x2   :  { %14 = vsyncpa [#allocation9], 0 }
   0x3   :  { %15 = vsyncpa [#allocation4], 0  ;;  %s888_s24 = smov [#allocation5]   ;;  %s770_s28 = scalar_lea.hbm %s1014_s1, 512 }
   0x4   :  { %s31_s25 = sshll.u32 %s888_s24, 4  ;;  %p771_p0 = scmp.ne.s32.totalorder %s1014_s1, %s770_s28  ;;  %s32_s25 = int_to_ptr.vmem [resolvable:$true] %s31_s25 }
   0x5   :  { %p774_p1 = scmp.lt.u32.totalorder %s770_s28, %s1014_s1 }
   0x7   :  { %p776_p2 = pnand %p774_p1, %p771_p0 }
   0x9   :  { %779 = shalt.err (!%p776_p2)
}
   0xa   :  { %s780_s10 = scalar_lea.vmem %s32_s25, 512  ;;  %p785_p4 = scmp.lt.s32.totalorder %s32_s25, %s32_s25 }
   0xb   :  { %p781_p3 = scmp.ne.s32.totalorder %s32_s25, %s780_s10  ;;  %p786_p5 = scmp.lt.s32.totalorder %s780_s10, %s780_s10 }
   0xd   :  { %p787_p6 = por %p786_p5, %p785_p4 }
   0xf   :  { %p788_p7 = pnand %p787_p6, %p781_p3 }
  0x11   :  { %791 = shalt.err (!%p788_p7)
}
  0x12   :  { %s889_s11 = smov 128   ;;  %s890_s12 = smov 8  }
  0x13   :  { %37 = dma.hbm_to_vmem [thread:$0]  %s1014_s1, 512, %s32_s25, [#allocation6], %s889_s11, %s889_s11, %s890_s12  }
  0x14   :  { %s891_s15 = smov [#allocation2]   ;;  %s892_s17 = smov [#allocation7]  }
  0x15   :  { %s22_s16 = sshll.u32 %s891_s15, 4  ;;  %s45_s18 = sshll.u32 %s892_s17, 4  ;;  %s23_s16 = int_to_ptr.vmem [resolvable:$true] %s22_s16  ;;  %s46_s18 = int_to_ptr.vmem [resolvable:$true] %s45_s18 }
  0x16   :  { %s792_s21 = scalar_lea.hbm %s1013_s0, 128 }
  0x17   :  { %p793_p8 = scmp.ne.s32.totalorder %s1013_s0, %s792_s21  ;;  %p796_p9 = scmp.lt.u32.totalorder %s792_s21, %s1013_s0 }
  0x19   :  { %p798_p10 = pnand %p796_p9, %p793_p8 }
  0x1b   :  { %801 = shalt.err (!%p798_p10)
}
  0x1c   :  { %s802_s1 = scalar_lea.vmem %s23_s16, 128  ;;  %p807_p12 = scmp.lt.s32.totalorder %s23_s16, %s23_s16 }
  0x1d   :  { %p803_p11 = scmp.ne.s32.totalorder %s23_s16, %s802_s1  ;;  %p808_p13 = scmp.lt.s32.totalorder %s802_s1, %s802_s1 }
  0x1f   :  { %p809_p0 = por %p808_p13, %p807_p12 }
  0x21   :  { %p810_p1 = pnand %p809_p0, %p803_p11 }
  0x23   :  { %813 = shalt.err (!%p810_p1)
}
  0x24   :  { %25 = dma.hbm_to_vmem [thread:$0]  %s1013_s0, 128, %s23_s16, [#allocation3]  }
  0x25   :  { %s814_s30 = scalar_lea.hbm %s1016_s3, 4096 }
  0x26   :  { %p815_p2 = scmp.ne.s32.totalorder %s1016_s3, %s814_s30  ;;  %p818_p3 = scmp.lt.u32.totalorder %s814_s30, %s1016_s3 }
  0x28   :  { %p820_p4 = pnand %p818_p3, %p815_p2 }
  0x2a   :  { %823 = shalt.err (!%p820_p4)
}
  0x2b   :  { %s824_s14 = scalar_lea.vmem %s46_s18, 4096  ;;  %p829_p6 = scmp.lt.s32.totalorder %s46_s18, %s46_s18 }
  0x2c   :  { %p825_p5 = scmp.ne.s32.totalorder %s46_s18, %s824_s14  ;;  %p830_p7 = scmp.lt.s32.totalorder %s824_s14, %s824_s14 }
  0x2e   :  { %p831_p8 = por %p830_p7, %p829_p6 }
  0x30   :  { %p832_p9 = pnand %p831_p8, %p825_p5 }
  0x32   :  { %835 = shalt.err (!%p832_p9)
}
  0x33   :  { %51 = dma.hbm_to_vmem [thread:$0]  %s1016_s3, 4096, %s46_s18, [#allocation6], %s889_s11, %s889_s11, %s890_s12  }
  0x34   :  { %s893_s16 = smov [#allocation8]   ;;  %s836_s21 = scalar_lea.hbm %s1018_s5, 2048 }
  0x35   :  { %s59_s17 = sshll.u32 %s893_s16, 4  ;;  %p837_p10 = scmp.ne.s32.totalorder %s1018_s5, %s836_s21  ;;  %s60_s17 = int_to_ptr.vmem [resolvable:$true] %s59_s17 }
  0x36   :  { %p840_p11 = scmp.lt.u32.totalorder %s836_s21, %s1018_s5 }
  0x38   :  { %p842_p12 = pnand %p840_p11, %p837_p10 }
  0x3a   :  { %845 = shalt.err (!%p842_p12)
}
  0x3b   :  { %s846_s1 = scalar_lea.vmem %s60_s17, 2048  ;;  %p851_p0 = scmp.lt.s32.totalorder %s60_s17, %s60_s17 }
  0x3c   :  { %p847_p13 = scmp.ne.s32.totalorder %s60_s17, %s846_s1  ;;  %p852_p1 = scmp.lt.s32.totalorder %s846_s1, %s846_s1 }
  0x3e   :  { %p853_p2 = por %p852_p1, %p851_p0 }
  0x40   :  { %p854_p3 = pnand %p853_p2, %p847_p13 }
  0x42   :  { %857 = shalt.err (!%p854_p3)
}
  0x43   :  { %s894_s3 = smov 64   ;;  %s895_s11 = smov 4  }
  0x44   :  { %65 = dma.hbm_to_vmem [thread:$0]  %s1018_s5, 2048, %s60_s17, [#allocation9], %s894_s3, %s894_s3, %s895_s11  }
  0x45   :  { %880 = dma.done.wait [#allocation3], 128  }
  0x46   :  { %881 = vsyncadd [#allocation3], 4294967168 }
  0x47   :  { %882 = dma.done.wait [#allocation6], 4608  }
  0x48   :  { %883 = vsyncadd [#allocation6], 4294962688 }
  0x49   :  { %884 = dma.done.wait [#allocation9], 2048  }
  0x4a   :  { %885 = vsyncadd [#allocation9], 4294965248  ;;  %v896_v0 = vmov 0   ;;  %v698_v1 = vld [vmem:[#allocation5 + $0x4] ss:$8 sps:$4 sm:$0xff]   ;;  %v81_v5 = vld [vmem:[#allocation2] sm:$0xff]  ;;  %v89_v51 = vlaneseq }
  0x4b   :  { %155 = vmatprep.mubr.bf16.mxu0 %v896_v0  ;;  %v700_v2 = vld [vmem:[#allocation5] ss:$8 sps:$4 sm:$0xff]   ;;  %123 = vmatprep.subr.bf16.mxu0 %v698_v1  ;;  %v701_v3 = vld [vmem:[#allocation5 + $0x14] ss:$8 sps:$4 sm:$0xff]   ;;  %v703_v4 = vld [vmem:[#allocation5 + $0x10] ss:$8 sps:$4 sm:$0xff]   ;;  %v82_v9 = vpack.c.bf16 %v81_v5, %v81_v5 }
  0x4c   :  { %124 = vmatpush1.bf16.msra.mxu0 %v700_v2  ;;  %v704_v6 = vld [vmem:[#allocation7 + $0x4] ss:$8 sps:$4 sm:$0xff]   ;;  %v706_v7 = vld [vmem:[#allocation7] ss:$8 sps:$4 sm:$0xff]   ;;  %v707_v8 = vld [vmem:[#allocation7 + $0x14] ss:$8 sps:$4 sm:$0xff]  }
  0x4d   :  { %125 = vmatprep.subr.bf16.mxu0 %v701_v3  ;;  %372 = vmatprep.subr.bf16.mxu1 %v704_v6  ;;  %v709_v10 = vld [vmem:[#allocation7 + $0x10] ss:$8 sps:$4 sm:$0xff]   ;;  %vm119_vm0 = vcmask 261120   ;;  %v710_v11 = vld [vmem:[#allocation7 + $0x24] ss:$8 sps:$4 sm:$0xff]   ;;  %v90_v52 = vshrl.u32 %v89_v51, 7 }
  0x4e   :  { %373 = vmatpush1.bf16.msra.mxu1 %v706_v7  ;;  %v712_v12 = vld [vmem:[#allocation7 + $0x20] ss:$8 sps:$4 sm:$0xff]   ;;  %v713_v13 = vld [vmem:[#allocation7 + $0x34] ss:$8 sps:$4 sm:$0xff]   ;;  %v715_v14 = vld [vmem:[#allocation7 + $0x30] ss:$8 sps:$4 sm:$0xff]  }
  0x4f   :  { %374 = vmatprep.subr.bf16.mxu1 %v707_v8  ;;  %v716_v15 = vld [vmem:[#allocation7 + $0x44] ss:$8 sps:$4 sm:$0xff]   ;;  %v718_v16 = vld [vmem:[#allocation7 + $0x40] ss:$8 sps:$4 sm:$0xff]   ;;  %v719_v17 = vld [vmem:[#allocation7 + $0x54] ss:$8 sps:$4 sm:$0xff]  }
  0x50   :  { %126 = vmatpush1.bf16.msra.mxu0 %v703_v4  ;;  %v721_v18 = vld [vmem:[#allocation7 + $0x50] ss:$8 sps:$4 sm:$0xff]   ;;  %v722_v19 = vld [vmem:[#allocation7 + $0x64] ss:$8 sps:$4 sm:$0xff]   ;;  %v724_v20 = vld [vmem:[#allocation7 + $0x60] ss:$8 sps:$4 sm:$0xff]  }
  0x51   :  { %v725_v21 = vld [vmem:[#allocation7 + $0x74] ss:$8 sps:$4 sm:$0xff]   ;;  %v727_v22 = vld [vmem:[#allocation7 + $0x70] ss:$8 sps:$4 sm:$0xff]   ;;  %v728_v23 = vld [vmem:[#allocation7 + $0x84] ss:$8 sps:$4 sm:$0xff]  }
  0x52   :  { %375 = vmatpush1.bf16.msra.mxu1 %v709_v10  ;;  %v730_v24 = vld [vmem:[#allocation7 + $0x80] ss:$8 sps:$4 sm:$0xff]   ;;  %v731_v25 = vld [vmem:[#allocation7 + $0x94] ss:$8 sps:$4 sm:$0xff]   ;;  %v733_v26 = vld [vmem:[#allocation7 + $0x90] ss:$8 sps:$4 sm:$0xff]  }
  0x53   :  { %616 = vmatmul.mubr.msk.bf16.vlgmr.msra.gmra.mrb[0].mxu0 %vm119_vm0, %v82_v9  ;;  %376 = vmatprep.subr.bf16.mxu1 %v710_v11  ;;  %v734_v27 = vld [vmem:[#allocation7 + $0xa4] ss:$8 sps:$4 sm:$0xff]   ;;  %v736_v28 = vld [vmem:[#allocation7 + $0xa0] ss:$8 sps:$4 sm:$0xff]   ;;  %v737_v29 = vld [vmem:[#allocation7 + $0xb4] ss:$8 sps:$4 sm:$0xff]  }
  0x54   :  { %v739_v30 = vld [vmem:[#allocation7 + $0xb0] ss:$8 sps:$4 sm:$0xff]   ;;  %v740_v31 = vld [vmem:[#allocation7 + $0xc4] ss:$8 sps:$4 sm:$0xff]   ;;  %v742_v32 = vld [vmem:[#allocation7 + $0xc0] ss:$8 sps:$4 sm:$0xff]  }
  0x55   :  { %v743_v33 = vld [vmem:[#allocation7 + $0xd4] ss:$8 sps:$4 sm:$0xff]   ;;  %v745_v34 = vld [vmem:[#allocation7 + $0xd0] ss:$8 sps:$4 sm:$0xff]   ;;  %v746_v35 = vld [vmem:[#allocation7 + $0xe4] ss:$8 sps:$4 sm:$0xff]  }
  0x56   :  { %377 = vmatpush1.bf16.msra.mxu1 %v712_v12  ;;  %v748_v36 = vld [vmem:[#allocation7 + $0xe0] ss:$8 sps:$4 sm:$0xff]   ;;  %v749_v37 = vld [vmem:[#allocation7 + $0xf4] ss:$8 sps:$4 sm:$0xff]   ;;  %v751_v38 = vld [vmem:[#allocation7 + $0xf0] ss:$8 sps:$4 sm:$0xff]  }
  0x57   :  { %378 = vmatprep.subr.bf16.mxu1 %v713_v13  ;;  %v752_v39 = vld [vmem:[#allocation8 + $0x40] sm:$0xff]   ;;  %v754_v41 = vld [vmem:[#allocation8 + $0x48] sm:$0xff]   ;;  %v756_v43 = vld [vmem:[#allocation8 + $0x50] sm:$0xff]   ;;  %v91_v53 = vsub.s32 0, %v90_v52  ;;  %v95_v55 = vsub.s32 1, %v90_v52 }
  0x58   :  { %v753_v40 = vld [vmem:[#allocation8] sm:$0xff]   ;;  %666 = vmatprep.subr.bf16.mxu0 %v752_v39  ;;  %v755_v42 = vld [vmem:[#allocation8 + $0x8] sm:$0xff]   ;;  %v757_v44 = vld [vmem:[#allocation8 + $0x10] sm:$0xff]  }
  0x59   :  { %667 = vmatpush3.bf16.msra.mxu0 %v753_v40  ;;  %v758_v45 = vld [vmem:[#allocation8 + $0x58] sm:$0xff]   ;;  %v760_v47 = vld [vmem:[#allocation8 + $0x60] sm:$0xff]   ;;  %v762_v49 = vld [vmem:[#allocation8 + $0x68] sm:$0xff]  }
  0x5a   :  { %379 = vmatpush1.bf16.msra.mxu1 %v715_v14  ;;  %668 = vmatprep.subr.bf16.mxu0 %v754_v41  ;;  %v759_v46 = vld [vmem:[#allocation8 + $0x18] sm:$0xff]   ;;  %v761_v48 = vld [vmem:[#allocation8 + $0x20] sm:$0xff]   ;;  %v763_v50 = vld [vmem:[#allocation8 + $0x28] sm:$0xff]  }
  0x5b   :  { %380 = vmatprep.subr.bf16.mxu1 %v716_v15  ;;  %v87_v54 = vld [vmem:[%s1015_s2] sm:$0x3]  ;;  %v764_v4 = vld [vmem:[#allocation8 + $0x70] sm:$0xff]  }
  0x5c   :  { %v92_v56 = vrot.slane %v87_v54, %v91_v53  ;;  %v96_v57 = vrot.slane %v87_v54, %v95_v55  ;;  %v765_v5 = vld [vmem:[#allocation8 + $0x30] sm:$0xff]   ;;  %v766_v6 = vld [vmem:[#allocation8 + $0x78] sm:$0xff]  }
  0x5d   :  { %669 = vmatpush3.bf16.msra.mxu0 %v755_v42  ;;  %v767_v7 = vld [vmem:[#allocation8 + $0x38] sm:$0xff]  }
  0x5e   :  { %381 = vmatpush1.bf16.msra.mxu1 %v718_v16  ;;  %670 = vmatprep.subr.bf16.mxu0 %v756_v43  ;;  %v200_v8 = vld [vmem:[%s1017_s4] sm:$0x3]  ;;  %s897_s4 = smov [#allocation10]  }
  0x5f   :  { %382 = vmatprep.subr.bf16.mxu1 %v719_v17  ;;  %v205_v9 = vrot.slane %v200_v8, %v91_v53  ;;  %v209_v10 = vrot.slane %v200_v8, %v95_v55  ;;  %s601_s30 = sshll.u32 %s897_s4, 4  ;;  %s602_s30 = int_to_ptr.vmem [resolvable:$true] %s601_s30 }
  0x60   :  { %s858_s8 = scalar_lea.vmem %s602_s30, 128  ;;  %p863_p5 = scmp.lt.s32.totalorder %s602_s30, %s602_s30 }
  0x61   :  { %671 = vmatpush3.bf16.msra.mxu0 %v757_v44  ;;  %p859_p4 = scmp.ne.s32.totalorder %s602_s30, %s858_s8  ;;  %p864_p6 = scmp.lt.s32.totalorder %s858_s8, %s858_s8 }
  0x62   :  { %383 = vmatpush1.bf16.msra.mxu1 %v721_v18  ;;  %672 = vmatprep.subr.bf16.mxu0 %v758_v45 }
  0x63   :  { %384 = vmatprep.subr.bf16.mxu1 %v722_v19  ;;  %p865_p7 = por %p864_p6, %p863_p5 }
  0x65   :  { %673 = vmatpush3.bf16.msra.mxu0 %v759_v46  ;;  %p866_p8 = pnand %p865_p7, %p859_p4 }
  0x66   :  { %385 = vmatpush1.bf16.msra.mxu1 %v724_v20  ;;  %674 = vmatprep.subr.bf16.mxu0 %v760_v47 }
  0x67   :  { %386 = vmatprep.subr.bf16.mxu1 %v725_v21 }
  0x69   :  { %675 = vmatpush3.bf16.msra.mxu0 %v761_v48 }
  0x6a   :  { %387 = vmatpush1.bf16.msra.mxu1 %v727_v22  ;;  %676 = vmatprep.subr.bf16.mxu0 %v762_v49  ;;  %v649_v22 = vld [vmem:[%s1019_s6] ss:$0 sm:$0xff] }
  0x6b   :  { %388 = vmatprep.subr.bf16.mxu1 %v728_v23 }
  0x6d   :  { %677 = vmatpush3.bf16.msra.mxu0 %v763_v50 }
  0x6e   :  { %389 = vmatpush1.bf16.msra.mxu1 %v730_v24  ;;  %678 = vmatprep.subr.bf16.mxu0 %v764_v4 }
  0x6f   :  { %390 = vmatprep.subr.bf16.mxu1 %v731_v25 }
  0x71   :  { %679 = vmatpush3.bf16.msra.mxu0 %v765_v5 }
  0x72   :  { %391 = vmatpush1.bf16.msra.mxu1 %v733_v26  ;;  %680 = vmatprep.subr.bf16.mxu0 %v766_v6 }
  0x73   :  { %392 = vmatprep.subr.bf16.mxu1 %v734_v27 }
  0x75   :  { %681 = vmatpush3.bf16.msra.mxu0 %v767_v7 }
  0x76   :  { %393 = vmatpush1.bf16.msra.mxu1 %v736_v28 }
  0x77   :  { %394 = vmatprep.subr.bf16.mxu1 %v737_v29 }
  0x7a   :  { %395 = vmatpush1.bf16.msra.mxu1 %v739_v30 }
  0x7b   :  { %396 = vmatprep.subr.bf16.mxu1 %v740_v31 }
  0x7e   :  { %397 = vmatpush1.bf16.msra.mxu1 %v742_v32 }
  0x7f   :  { %398 = vmatprep.subr.bf16.mxu1 %v743_v33 }
  0x82   :  { %399 = vmatpush1.bf16.msra.mxu1 %v745_v34 }
  0x83   :  { %400 = vmatprep.subr.bf16.mxu1 %v746_v35 }
  0x86   :  { %401 = vmatpush1.bf16.msra.mxu1 %v748_v36 }
  0x87   :  { %402 = vmatprep.subr.bf16.mxu1 %v749_v37 }
  0x8a   :  { %403 = vmatpush1.bf16.msra.mxu1 %v751_v38 }
 0x126   :  { %v157_v58 = vpop.f32.mrb[0].mxu0 }
 0x127   :  { %v158_v59 = vadd.f32 %v157_v58, %v92_v56  ;;  %v159_v60 = vpop.f32.mrb[1].mxu0 }
 0x128   :  { %v160_v61 = vadd.f32 %v159_v60, %v96_v57  ;;  %v161_v62 = vpop.f32.mrb[2].mxu0 }
 0x129   :  { %v164_v63 = vmax.f32 %v158_v59, 0.0  ;;  %v162_v0 = vpop.f32.mrb[3].mxu0 }
 0x12a   :  { %v165_v1 = vmax.f32 %v160_v61, 0.0 }
 0x12b   :  { %v166_v3 = vpack.c.bf16 %v164_v63, %v164_v63 }
 0x12c   :  { %v167_v2 = vpack.c.bf16 %v165_v1, %v165_v1 }
 0x12e   :  { %404 = vmatprep.mubr.bf16.mxu1 %v167_v2 }
 0x12f   :  { %405 = vmatmul.mubr.bf16.vlgmr.msra.gmra.mrb[0].mxu1 %v166_v3 }
 0x202   :  { %v406_v11 = vpop.f32.mrb[0].mxu1 }
 0x203   :  { %v407_v12 = vadd.f32 %v406_v11, %v205_v9  ;;  %v408_v13 = vpop.f32.mrb[1].mxu1 }
 0x204   :  { %v409_v14 = vadd.f32 %v408_v13, %v209_v10  ;;  %v410_v15 = vpop.f32.mrb[2].mxu1 }
 0x205   :  { %v413_v16 = vmax.f32 %v407_v12, 0.0  ;;  %v411_v17 = vpop.f32.mrb[3].mxu1 }
 0x206   :  { %v414_v18 = vmax.f32 %v409_v14, 0.0 }
 0x207   :  { %v415_v20 = vpack.c.bf16 %v413_v16, %v413_v16 }
 0x208   :  { %v416_v19 = vpack.c.bf16 %v414_v18, %v414_v18 }
 0x20a   :  { %584 = vmatprep.mubr.bf16.mxu0 %v416_v19 }
 0x20b   :  { %585 = vmatmul.mubr.bf16.vlgmr.msra.gmra.mrb[4].mxu0 %v415_v20 }
 0x2de   :  { %v682_v21 = vpop.f32.mrb[4].mxu0 }
 0x2df   :  { %v683_v23 = vpop.f32.mrb[5].mxu0 }
 0x2e0   :  { %v684_v24 = vadd.f32 %v683_v23, %v682_v21  ;;  %v685_v25 = vpop.f32.mrb[6].mxu0 }
 0x2e1   :  { %v686_v26 = vpop.f32.mrb[7].mxu0 }
 0x2e2   :  { %v587_v27 = vadd.f32 %v684_v24, %v649_v22 }
 0x2e4   :  { %768 = vtanh.f32 %v587_v27 }
 0x2ee   :  { %v769_v28 = vpop.eup %768 }
 0x2ef   :  { %v593_v29 = vmul.f32 2.0, %v769_v28 }
 0x2f1   :  { %594 = vst [vmem:[#allocation10] sm:$0xff] %v593_v29 }
 0x2f2   :  { %869 = shalt.err (!%p866_p8)
}
 0x2f3   :  { %s870_s10 = scalar_lea.hbm %s1020_s7, 128 }
 0x2f4   :  { %p871_p9 = scmp.ne.s32.totalorder %s1020_s7, %s870_s10  ;;  %p874_p10 = scmp.lt.u32.totalorder %s870_s10, %s1020_s7 }
 0x2f6   :  { %p876_p11 = pnand %p874_p10, %p871_p9 }
 0x2f8   :  { %879 = shalt.err (!%p876_p11)
}
 0x2f9   :  { %604 = dma.vmem_to_hbm [thread:$0]  %s602_s30, 128, %s1020_s7, [#allocation4]  }
 0x2fa   :  { %886 = dma.done.wait [#allocation4], 128  }
 0x2fb   :  { %887 = vsyncadd [#allocation4], 4294967168 }
 0x2fc   :  { %608 = vsyncpa [#allocation3], 1 }
 0x2fd   :  { %609 = vsyncpa [#allocation6], 1 }
 0x2fe   :  { %610 = vsyncpa [#allocation9], 1 }
 0x2ff   :  { %611 = vsyncpa [#allocation4], 1 }

</bundles_post_ra>
